<compile_context>
chip_gen: v6e
topology: v6e:2x2x1
jax: 0.10.0
libtpu: 0.0.40
codegen_flags: <defaults>
</compile_context>

<pallas_src>
import functools

import jax
import jax.numpy as jnp
from jax import lax
from jax.experimental import pallas as pl
from jax.experimental.pallas import tpu as pltpu


def _ce_label_smooth_kernel(logits_ref, xtgt_ref, loss_ref,
                            m_sc, l_sc, s_sc,
                            *, epsilon, num_classes, tile_k, has_ragged_k):
    """One (batch-tile, class-tile) grid step.

    logits_ref: (TB, TK) logits tile (native dtype)
    xtgt_ref:   (TB, 1)  f32 pre-gathered target logits x[i, targets[i]]
    loss_ref:   (TB, 1)  f32 per-sample loss (written on the last class tile)
    m_sc/l_sc/s_sc: (TB, 1) f32 running max / running sum-exp / running sum(x)
    """
    k = pl.program_id(1)
    last_k = pl.num_programs(1) - 1

    @pl.when(k == 0)
    def _init():
        m_sc[...] = jnp.full_like(m_sc, -jnp.inf)
        l_sc[...] = jnp.zeros_like(l_sc)
        s_sc[...] = jnp.zeros_like(s_sc)

    def accumulate(x_lse, x_sum):
        # Online log-sum-exp update + running sum(x).  Row-wise only, so
        # padding rows of partial batch tiles never pollute valid rows.
        m_prev = m_sc[...]
        m_new = jnp.maximum(m_prev, jnp.max(x_lse, axis=-1, keepdims=True))
        p = jnp.exp(x_lse - m_new)            # exp(-inf - finite) == 0: masked
        l_sc[...] = (jnp.exp(m_prev - m_new) * l_sc[...]
                     + jnp.sum(p, axis=-1, keepdims=True))
        m_sc[...] = m_new
        s_sc[...] += jnp.sum(x_sum, axis=-1, keepdims=True)

    if has_ragged_k:
        # Only the last class tile runs past num_classes -> masked slow path.
        @pl.when(k != last_k)
        def _fast():
            x = logits_ref[...].astype(jnp.float32)
            accumulate(x, x)

        @pl.when(k == last_k)
        def _masked():
            x = logits_ref[...].astype(jnp.float32)
            col = k * tile_k + lax.broadcasted_iota(jnp.int32, x.shape, 1)
            valid = col < num_classes
            # -inf columns vanish through exp(); zeroed columns drop from sum.
            accumulate(jnp.where(valid, x, -jnp.inf),
                       jnp.where(valid, x, 0.0))
    else:
        # Every class tile is full width: mask-free fast path everywhere.
        x = logits_ref[...].astype(jnp.float32)
        accumulate(x, x)

    @pl.when(k == last_k)
    def _finalize():
        # loss = logsumexp(x) - (1-eps)*x[target] - (eps/K)*sum(x)
        loss_ref[...] = (m_sc[...] + jnp.log(l_sc[...])
                         - (1.0 - epsilon) * xtgt_ref[...]
                         - (epsilon / num_classes) * s_sc[...])


def cross_entropy_label_smooth(logits, targets, *, epsilon=0.1, reduction=True,
                               max_tb=256, max_tk=4096):
    """JAX/Pallas equivalent of CrossEntropyLabelSmooth.forward.

    Args:
      logits:  (B, K) float array of pre-softmax predictions.
      targets: (B,) integer class labels.
      max_tb / max_tk: upper bounds on the batch / class tile sizes.  max_tb
        must be a multiple of 8 and max_tk a multiple of 128 (exposed mainly
        so small-shape tests can exercise the tiled / ragged paths).
    Returns:
      scalar mean loss if reduction else (B,) per-sample losses (float32).
    """
    B, K = logits.shape
    targets = targets.astype(jnp.int32)

    # Pre-gather the target logits: removes the one-hot compare/select/reduce
    # from the kernel hot loop.  A B-element gather in XLA is negligible
    # HBM traffic compared to streaming the (B, K) logits.
    x_tgt = jnp.take_along_axis(logits, targets[:, None], axis=1).astype(jnp.float32)

    # ---- tile sizes ----
    # Class tile: full K when it fits, otherwise a 128-aligned tile; the
    # ragged last tile (if any) is masked in-kernel.
    tk = K if K <= max_tk else max_tk
    has_ragged_k = (K % tk) != 0

    # Batch tile: split into at least two 8-aligned tiles when possible so the
    # "parallel" grid axis actually feeds both TensorCores on megacore parts.
    if B <= max_tb:
        half = (-(-B // 2) + 7) // 8 * 8          # round_up(cdiv(B, 2), 8)
        tb = half if half < B else B
    else:
        tb = max_tb

    grid = (pl.cdiv(B, tb), pl.cdiv(K, tk))

    kernel = functools.partial(
        _ce_label_smooth_kernel,
        epsilon=float(epsilon), num_classes=K, tile_k=tk,
        has_ragged_k=has_ragged_k)

    itemsize = jnp.dtype(logits.dtype).itemsize
    per_sample = pl.pallas_call(
        kernel,
        out_shape=jax.ShapeDtypeStruct((B, 1), jnp.float32),
        grid_spec=pltpu.PrefetchScalarGridSpec(
            num_scalar_prefetch=0,
            grid=grid,
            in_specs=[
                pl.BlockSpec((tb, tk), lambda i, k: (i, k)),
                pl.BlockSpec((tb, 1), lambda i, k: (i, 0)),
            ],
            out_specs=pl.BlockSpec((tb, 1), lambda i, k: (i, 0)),
            scratch_shapes=[
                pltpu.VMEM((tb, 1), jnp.float32),   # running max m
                pltpu.VMEM((tb, 1), jnp.float32),   # running sum-exp l
                pltpu.VMEM((tb, 1), jnp.float32),   # running sum(x)
            ],
        ),
        compiler_params=pltpu.CompilerParams(
            dimension_semantics=("parallel", "arbitrary"),
            # Double-buffered (256, 4096) f32 logits tile is 8 MiB; 48 MiB
            # stays under v7x's 64 MiB physical VMEM with headroom and lets
            # callers raise max_tk/max_tb further on v5e/v6e.
            vmem_limit_bytes=48 * 1024 * 1024),
        cost_estimate=pl.CostEstimate(
            flops=5 * B * K,
            transcendentals=B * K,
            bytes_accessed=B * K * itemsize + 3 * B * 4),
    )(logits, x_tgt)

    per_sample = per_sample.reshape(B)
    if reduction:
        return jnp.mean(per_sample)
    return per_sample


def _reference(logits, targets, epsilon):
    K = logits.shape[1]
    log_probs = jax.nn.log_softmax(logits.astype(jnp.float32), axis=1)
    one_hot = jax.nn.one_hot(targets, K, dtype=jnp.float32)
    smooth = (1.0 - epsilon) * one_hot + epsilon / K
    return jnp.sum(-smooth * log_probs, axis=1)


if __name__ == "__main__":
    key = jax.random.PRNGKey(0)

    # --- test 1: single-block path (B, K both fit one tile) ---
    k1, k2 = jax.random.split(key)
    B, K = 8, 32
    logits = jax.random.normal(k1, (B, K), dtype=jnp.float32)
    targets = jax.random.randint(k2, (B,), 0, K, dtype=jnp.int32)

    loss = cross_entropy_label_smooth(logits, targets, epsilon=0.1, reduction=True)
    loss = jax.block_until_ready(loss)
    ref = jnp.mean(_reference(logits, targets, 0.1))
    assert jnp.allclose(loss, ref, atol=1e-5, rtol=1e-5), (loss, ref)

    # --- test 2: tiled path (partial batch tiles + ragged, masked class tile) ---
    k3, k4 = jax.random.split(k1)
    B2, K2 = 20, 200
    logits2 = jax.random.normal(k3, (B2, K2), dtype=jnp.float32)
    targets2 = jax.random.randint(k4, (B2,), 0, K2, dtype=jnp.int32)

    per_sample = cross_entropy_label_smooth(
        logits2, targets2, epsilon=0.1, reduction=False, max_tb=8, max_tk=128)
    per_sample = jax.block_until_ready(per_sample)
    ref2 = _reference(logits2, targets2, 0.1)
    assert jnp.allclose(per_sample, ref2, atol=1e-5, rtol=1e-5), (per_sample, ref2)

    # --- test 3: default tiles, megacore batch split + partial batch tile,
    #             mask-free class path (tk == K) ---
    k5, k6 = jax.random.split(k3)
    B3, K3 = 24, 300
    logits3 = jax.random.normal(k5, (B3, K3), dtype=jnp.float32)
    targets3 = jax.random.randint(k6, (B3,), 0, K3, dtype=jnp.int32)

    loss3 = cross_entropy_label_smooth(logits3, targets3, epsilon=0.1, reduction=True)
    loss3 = jax.block_until_ready(loss3)
    ref3 = jnp.mean(_reference(logits3, targets3, 0.1))
    assert jnp.allclose(loss3, ref3, atol=1e-5, rtol=1e-5), (loss3, ref3)

    # --- test 4: bf16 logits streamed natively (cast to f32 only in-kernel) ---
    k7, k8 = jax.random.split(k5)
    B4, K4 = 16, 256
    logits4 = jax.random.normal(k7, (B4, K4), dtype=jnp.float32).astype(jnp.bfloat16)
    targets4 = jax.random.randint(k8, (B4,), 0, K4, dtype=jnp.int32)

    loss4 = cross_entropy_label_smooth(logits4, targets4, epsilon=0.1, reduction=True)
    loss4 = jax.block_until_ready(loss4)
    ref4 = jnp.mean(_reference(logits4, targets4, 0.1))
    assert jnp.allclose(loss4, ref4, atol=1e-3, rtol=1e-3), (loss4, ref4)

    print("KERNEL_OK")
</pallas_src>

<mosaic_0001>
module attributes {stable_mosaic.version = 11 : i64} {
  func.func @_ce_label_smooth_kernel(%arg0: i32, %arg1: i32, %arg2: memref<8x32xf32, #tpu.memory_space<vmem>>, %arg3: memref<8x1xf32, #tpu.memory_space<vmem>>, %arg4: memref<8x1xf32, #tpu.memory_space<vmem>>, %arg5: memref<8x1xf32, #tpu.memory_space<vmem>>, %arg6: memref<8x1xf32, #tpu.memory_space<vmem>>, %arg7: memref<8x1xf32, #tpu.memory_space<vmem>>) attributes {dimension_semantics = [#tpu.dimension_semantics<parallel>, #tpu.dimension_semantics<arbitrary>], iteration_bounds = array<i64: 1, 1>, scalar_prefetch = 0 : i64, scratch_operands = 3 : i64, tpu.core_type = #tpu.core_type<tc>, window_params = [{transform_indices = @transform_0, window_bounds = array<i64: 8, 32>}, {transform_indices = @transform_1, window_bounds = array<i64: 8, 1>}, {transform_indices = @transform_2, window_bounds = array<i64: 8, 1>}]} {
    %c0_i32 = arith.constant 0 : i32
    %0 = arith.cmpi eq, %arg1, %c0_i32 : i32
    %1 = arith.extui %0 : i1 to i32
    %c0_i32_0 = arith.constant 0 : i32
    %2 = arith.cmpi ne, %1, %c0_i32_0 : i32
    scf.if %2 {
      %cst_18 = arith.constant 0xFF800000 : f32
      %28 = vector.broadcast %cst_18 : f32 to vector<8x1xf32>
      %c0_19 = arith.constant 0 : index
      %c0_20 = arith.constant 0 : index
      %29 = vector.load %arg5[%c0_19, %c0_20] : memref<8x1xf32, #tpu.memory_space<vmem>>, vector<8x1xf32>
      tpu.vector_store %arg5[%c0_19, %c0_20], %28 {strides = array<i32>} : memref<8x1xf32, #tpu.memory_space<vmem>>, vector<8x1xf32>,
      %cst_21 = arith.constant 0.000000e+00 : f32
      %30 = vector.broadcast %cst_21 : f32 to vector<8x1xf32>
      %c0_22 = arith.constant 0 : index
      %c0_23 = arith.constant 0 : index
      %31 = vector.load %arg6[%c0_22, %c0_23] : memref<8x1xf32, #tpu.memory_space<vmem>>, vector<8x1xf32>
      tpu.vector_store %arg6[%c0_22, %c0_23], %30 {strides = array<i32>} : memref<8x1xf32, #tpu.memory_space<vmem>>, vector<8x1xf32>,
      %cst_24 = arith.constant 0.000000e+00 : f32
      %32 = vector.broadcast %cst_24 : f32 to vector<8x1xf32>
      %c0_25 = arith.constant 0 : index
      %c0_26 = arith.constant 0 : index
      %33 = vector.load %arg7[%c0_25, %c0_26] : memref<8x1xf32, #tpu.memory_space<vmem>>, vector<8x1xf32>
      tpu.vector_store %arg7[%c0_25, %c0_26], %32 {strides = array<i32>} : memref<8x1xf32, #tpu.memory_space<vmem>>, vector<8x1xf32>,
    } else {
    }
    %c0 = arith.constant 0 : index
    %c0_1 = arith.constant 0 : index
    %3 = vector.load %arg2[%c0, %c0_1] : memref<8x32xf32, #tpu.memory_space<vmem>>, vector<8x32xf32>
    %c0_2 = arith.constant 0 : index
    %c0_3 = arith.constant 0 : index
    %4 = vector.load %arg5[%c0_2, %c0_3] : memref<8x1xf32, #tpu.memory_space<vmem>>, vector<8x1xf32>
    %cst = arith.constant dense<0xFF800000> : vector<8xf32>
    %5 = vector.multi_reduction <maximumf>, %3, %cst [1] : vector<8x32xf32> to vector<8xf32>
    %6 = vector.shape_cast %5 : vector<8xf32> to vector<8x1xf32>
    %7 = arith.maximumf %4, %6 : vector<8x1xf32>
    %8 = vector.broadcast %7 : vector<8x1xf32> to vector<8x32xf32>
    %9 = arith.subf %3, %8 : vector<8x32xf32>
    %10 = math.exp %9 : vector<8x32xf32>
    %11 = arith.subf %4, %7 : vector<8x1xf32>
    %12 = math.exp %11 : vector<8x1xf32>
    %c0_4 = arith.constant 0 : index
    %c0_5 = arith.constant 0 : index
    %13 = vector.load %arg6[%c0_4, %c0_5] : memref<8x1xf32, #tpu.memory_space<vmem>>, vector<8x1xf32>
    %14 = arith.mulf %12, %13 : vector<8x1xf32>
    %cst_6 = arith.constant dense<0.000000e+00> : vector<8xf32>
    %15 = vector.multi_reduction <add>, %10, %cst_6 [1] : vector<8x32xf32> to vector<8xf32>
    %16 = vector.shape_cast %15 : vector<8xf32> to vector<8x1xf32>
    %17 = arith.addf %14, %16 : vector<8x1xf32>
    %c0_7 = arith.constant 0 : index
    %c0_8 = arith.constant 0 : index
    %18 = vector.load %arg6[%c0_7, %c0_8] : memref<8x1xf32, #tpu.memory_space<vmem>>, vector<8x1xf32>
    tpu.vector_store %arg6[%c0_7, %c0_8], %17 {strides = array<i32>} : memref<8x1xf32, #tpu.memory_space<vmem>>, vector<8x1xf32>,
    %c0_9 = arith.constant 0 : index
    %c0_10 = arith.constant 0 : index
    %19 = vector.load %arg5[%c0_9, %c0_10] : memref<8x1xf32, #tpu.memory_space<vmem>>, vector<8x1xf32>
    tpu.vector_store %arg5[%c0_9, %c0_10], %7 {strides = array<i32>} : memref<8x1xf32, #tpu.memory_space<vmem>>, vector<8x1xf32>,
    %c0_11 = arith.constant 0 : index
    %c0_12 = arith.constant 0 : index
    %20 = vector.load %arg7[%c0_11, %c0_12] : memref<8x1xf32, #tpu.memory_space<vmem>>, vector<8x1xf32>
    %cst_13 = arith.constant dense<0.000000e+00> : vector<8xf32>
    %21 = vector.multi_reduction <add>, %3, %cst_13 [1] : vector<8x32xf32> to vector<8xf32>
    %22 = vector.shape_cast %21 : vector<8xf32> to vector<8x1xf32>
    %23 = arith.addf %20, %22 : vector<8x1xf32>
    %c0_14 = arith.constant 0 : index
    %c0_15 = arith.constant 0 : index
    %24 = vector.load %arg7[%c0_14, %c0_15] : memref<8x1xf32, #tpu.memory_space<vmem>>, vector<8x1xf32>
    tpu.vector_store %arg7[%c0_14, %c0_15], %23 {strides = array<i32>} : memref<8x1xf32, #tpu.memory_space<vmem>>, vector<8x1xf32>,
    %c0_i32_16 = arith.constant 0 : i32
    %25 = arith.cmpi eq, %arg1, %c0_i32_16 : i32
    %26 = arith.extui %25 : i1 to i32
    %c0_i32_17 = arith.constant 0 : i32
    %27 = arith.cmpi ne, %26, %c0_i32_17 : i32
    scf.if %27 {
      %c0_18 = arith.constant 0 : index
      %c0_19 = arith.constant 0 : index
      %28 = vector.load %arg5[%c0_18, %c0_19] : memref<8x1xf32, #tpu.memory_space<vmem>>, vector<8x1xf32>
      %c0_20 = arith.constant 0 : index
      %c0_21 = arith.constant 0 : index
      %29 = vector.load %arg6[%c0_20, %c0_21] : memref<8x1xf32, #tpu.memory_space<vmem>>, vector<8x1xf32>
      %30 = math.log %29 : vector<8x1xf32>
      %31 = arith.addf %28, %30 : vector<8x1xf32>
      %c0_22 = arith.constant 0 : index
      %c0_23 = arith.constant 0 : index
      %32 = vector.load %arg3[%c0_22, %c0_23] : memref<8x1xf32, #tpu.memory_space<vmem>>, vector<8x1xf32>
      %cst_24 = arith.constant 0.899999976 : f32
      %33 = vector.broadcast %cst_24 : f32 to vector<8x1xf32>
      %34 = arith.mulf %33, %32 : vector<8x1xf32>
      %35 = arith.subf %31, %34 : vector<8x1xf32>
      %c0_25 = arith.constant 0 : index
      %c0_26 = arith.constant 0 : index
      %36 = vector.load %arg7[%c0_25, %c0_26] : memref<8x1xf32, #tpu.memory_space<vmem>>, vector<8x1xf32>
      %cst_27 = arith.constant 3.125000e-03 : f32
      %37 = vector.broadcast %cst_27 : f32 to vector<8x1xf32>
      %38 = arith.mulf %37, %36 : vector<8x1xf32>
      %39 = arith.subf %35, %38 : vector<8x1xf32>
      %c0_28 = arith.constant 0 : index
      %c0_29 = arith.constant 0 : index
      %40 = vector.load %arg4[%c0_28, %c0_29] : memref<8x1xf32, #tpu.memory_space<vmem>>, vector<8x1xf32>
      tpu.vector_store %arg4[%c0_28, %c0_29], %39 {strides = array<i32>} : memref<8x1xf32, #tpu.memory_space<vmem>>, vector<8x1xf32>,
    } else {
    }
    return
  }
  func.func @transform_0(%arg0: i32, %arg1: i32) -> (i32, i32) {
    %c0_i32 = arith.constant 0 : i32
    return %arg0, %arg1 : i32, i32
  }
  func.func @transform_1(%arg0: i32, %arg1: i32) -> (i32, i32) {
    %c0_i32 = arith.constant 0 : i32
    %c0_i32_0 = arith.constant 0 : i32
    return %arg0, %c0_i32 : i32, i32
  }
  func.func @transform_2(%arg0: i32, %arg1: i32) -> (i32, i32) {
    %c0_i32 = arith.constant 0 : i32
    %c0_i32_0 = arith.constant 0 : i32
    return %arg0, %c0_i32 : i32, i32
  }
}

</mosaic_0001>

<bundles_post_ra>
// kernel: tpu_custom_call.1
= control target key start
LH: loop header
LB: loop body
LE: loop exit
PB: predicated region body
PF: predicated region fallthrough
CT: control target
= control target key end

     0   :  { %vm21_vm0 = vcmask 261120   ;;  %vm15_vm1 = vcmask 7168   ;;  %v81_v1 = vmov -inf   ;;  %v82_v3 = vmov 0   ;;  %s118_s0 = inlined_call_operand.vmem [shape: f32[8,32], index: 0, kind: input, shape index: {}]   ;;  %s119_s1 = inlined_call_operand.vmem [shape: f32[8,1], index: 1, kind: input, shape index: {}]   ;;  %s120_s2 = inlined_call_operand.vmem [shape: f32[8,1], index: 2, kind: output, shape index: {}]  }
   0x1   :  { %v19_v0 = vld [vmem:[%s118_s0] sm:$0xff]  ;;  %16 = vst.msk [vmem:[#allocation2] sm:$0xff] %vm15_vm1, %v81_v1  ;;  %74 = vset.pattern.permute.xlu0 %v82_v3  ;;  %v83_v4 = vmov 0.0  }
   0x2   :  { %v22_v2 = vsel %vm21_vm0, %v19_v0, -inf  ;;  %17 = vst.msk [vmem:[#allocation3] sm:$0xff] %vm15_vm1, %v83_v4  ;;  %18 = vst.msk [vmem:[#allocation4] sm:$0xff] %vm15_vm1, %v83_v4  ;;  %v47_v14 = vsel %vm21_vm0, %v19_v0, 0.0  ;;  %v60_v25 = vld [vmem:[%s119_s1] sm:$0xff] }
   0x3   :  { %23 = vmax.xlane.f32.xlu0 %v22_v2  ;;  %v61_v29 = vmul.f32 0.9, %v60_v25 }
   0x8   :  { %v20_v5 = vld [vmem:[#allocation2] sm:$0xff] }
   0x9   :  { %v37_v17 = vld [vmem:[#allocation3] sm:$0xff]  ;;  %v46_v21 = vld [vmem:[#allocation4] sm:$0xff] }
  0x8c   :  { %v24_v6 = vpop.xlane.xlu0 %23 }
  0x8d   :  { %v25_v7 = vmax.f32 %v20_v5, %v24_v6 }
  0x8f   :  { %v34_v8 = vsub.f32 %v20_v5, %v25_v7  ;;  %45 = vst.msk [vmem:[#allocation2] sm:$0xff] %vm15_vm1, %v25_v7  ;;  %28 = vperm.xlu0 %74, %v25_v7  }
  0x91   :  { %v35_v15 = vmul.f32 1.442695, %v34_v8 }
  0x96   :  { %v55_v30 = vld [vmem:[#allocation2] sm:$0xff] }
 0x10a   :  { %v29_v9 = vpop.permute.xlu0 %28 }
 0x10b   :  { %v31_v10 = vsub.f32 %v19_v0, %v29_v9 }
 0x10d   :  { %v32_v11 = vmul.f32 1.442695, %v31_v10 }
 0x10f   :  { %75 = vpow2.f32 %v32_v11 }
 0x110   :  { %77 = vpow2.f32 %v35_v15 }
 0x11c   :  { %v76_v12 = vpop.eup %75 }
 0x11d   :  { %v39_v13 = vsel %vm21_vm0, %v76_v12, 0.0  ;;  %v78_v16 = vpop.eup %77 }
 0x11e   :  { %40 = vadd.xlane.f32.xlu1 %v39_v13  ;;  %v38_v18 = vmul.f32 %v78_v16, %v37_v17 }
 0x122   :  { %48 = vadd.xlane.f32.xlu1 %v47_v14 }
 0x1a7   :  { %v41_v19 = vpop.xlane.xlu1 %40 }
 0x1a8   :  { %v42_v20 = vadd.f32 %v41_v19, %v38_v18 }
 0x1aa   :  { %44 = vst.msk [vmem:[#allocation3] sm:$0xff] %vm15_vm1, %v42_v20 }
 0x1ab   :  { %v49_v22 = vpop.xlane.xlu1 %48 }
 0x1ac   :  { %v50_v23 = vadd.f32 %v49_v22, %v46_v21 }
 0x1ae   :  { %51 = vst.msk [vmem:[#allocation4] sm:$0xff] %vm15_vm1, %v50_v23 }
 0x1b1   :  { %v56_v24 = vld [vmem:[#allocation3] sm:$0xff] }
 0x1b2   :  { %79 = vlog2.f32 %v56_v24 }
 0x1b5   :  { %v63_v27 = vld [vmem:[#allocation4] sm:$0xff] }
 0x1b6   :  { %v64_v32 = vmul.f32 0.003125, %v63_v27 }
 0x1bf   :  { %v80_v26 = vpop.eup %79 }
 0x1c0   :  { %v58_v28 = vmul.f32 0.6931472, %v80_v26 }
 0x1c2   :  { %v59_v31 = vadd.f32 %v58_v28, %v55_v30 }
 0x1c4   :  { %v62_v33 = vsub.f32 %v59_v31, %v61_v29 }
 0x1c6   :  { %v65_v34 = vsub.f32 %v62_v33, %v64_v32 }
 0x1c8   :  { %66 = vst.msk [vmem:[%s120_s2] sm:$0xff] %vm15_vm1, %v65_v34 }

</bundles_post_ra>
